<compile_context>
chip_gen: v6e
topology: v6e:2x2x1
jax: 0.10.0
libtpu: 0.0.40
codegen_flags: <defaults>
</compile_context>

<pallas_src>
import math

import jax
import jax.numpy as jnp
from jax.experimental import pallas as pl
from jax.experimental.pallas import tpu as pltpu


def _round_up(x, m):
    return ((x + m - 1) // m) * m


def _pick_hidden_tile(H):
    """Largest convenient H tile: full H when small, else a 128-multiple divisor."""
    if H <= 2048:
        return H
    for th in (2048, 1024, 512, 256, 128):
        if H % th == 0:
            return th
    return H  # no clean divisor; fall back to full H


def mlp_kernel(x_ref, w1_ref, b1_ref, w2_ref, b2_ref, o_ref, acc_ref):
    # x_ref: (TM, Cp), w1_ref: (Cp, TH), b1_ref: (1, TH),
    # w2_ref: (TH, Cp), b2_ref: (1, Cp), o_ref: (TM, Cp), acc_ref: (TM, Cp) f32
    h_idx = pl.program_id(1)

    @pl.when(h_idx == 0)
    def _():
        acc_ref[...] = jnp.zeros_like(acc_ref)

    # c_fc slice: native-dtype operands on the MXU, f32 accumulation.
    h = jnp.dot(x_ref[...], w1_ref[...], preferred_element_type=jnp.float32)
    h = h + b1_ref[...].astype(jnp.float32)

    # new_gelu (tanh approximation, exactly as in the reference), in f32.
    c = jnp.float32(math.sqrt(2.0 / math.pi))
    g = 0.5 * h * (1.0 + jnp.tanh(c * (h + 0.044715 * (h * h) * h)))

    # Partial c_proj: accumulate this H tile's contribution (K-reduction).
    acc_ref[...] += jnp.dot(g.astype(w2_ref.dtype), w2_ref[...],
                            preferred_element_type=jnp.float32)

    @pl.when(h_idx == pl.num_programs(1) - 1)
    def _():
        # Dropout with p=0.0 is the identity; add b2 once at finalize.
        o_ref[...] = (acc_ref[...] + b2_ref[...].astype(jnp.float32)).astype(o_ref.dtype)


def mlp_pallas(x, w1, b1, w2, b2):
    """x: (B, T, C); w1: (C, 4C); b1: (4C,); w2: (4C, C); b2: (C,)."""
    B, T, C = x.shape
    H = w1.shape[1]
    M = B * T

    x2d = x.reshape(M, C)
    b1_2d = b1.reshape(1, H)
    b2_2d = b2.reshape(1, C)

    # Lane-dense padding of the model dim: unmasked full-lane loads/stores.
    C_pad = _round_up(C, 128)
    if C_pad != C:
        pc = C_pad - C
        x2d = jnp.pad(x2d, ((0, 0), (0, pc)))           # zero cols: no effect on x@W1
        w1 = jnp.pad(w1, ((0, pc), (0, 0)))              # zero rows: no effect on x@W1
        w2 = jnp.pad(w2, ((0, 0), (0, pc)))              # zero cols: padded outputs = 0
        b2_2d = jnp.pad(b2_2d, ((0, 0), (0, pc)))        # padded bias = 0

    # Row tile: up to 256 rows (full MXU cadence), padded to a multiple of 8.
    TM = min(256, _round_up(M, 8))
    M_pad = _round_up(M, TM)
    if M_pad != M:
        x2d = jnp.pad(x2d, ((0, M_pad - M), (0, 0)))

    TH = _pick_hidden_tile(H)
    n_m = M_pad // TM
    n_h = H // TH

    # VMEM budget estimate (double-buffered tiles + accumulator + live f32 hidden).
    itm = x.dtype.itemsize
    wbt = w1.dtype.itemsize
    est = (2 * TM * C_pad * itm          # x tiles (double-buffered)
           + 2 * C_pad * TH * wbt        # w1 tile
           + 2 * TH * C_pad * wbt        # w2 tile
           + 2 * TM * C_pad * itm        # out tiles
           + TM * C_pad * 4              # f32 accumulator
           + 2 * TM * TH * 4)            # live f32 hidden / gelu tile
    vmem_limit = int(min(64 * 1024 * 1024, max(32 * 1024 * 1024, 2 * est)))

    cost = pl.CostEstimate(
        flops=4 * M * C * H,              # two matmuls: 2*M*C*H each
        transcendentals=M * H,            # tanh
        bytes_accessed=(M * C * itm + C * H * wbt + H * b1.dtype.itemsize
                        + H * C * wbt + C * b2.dtype.itemsize + M * C * itm),
    )

    out = pl.pallas_call(
        mlp_kernel,
        out_shape=jax.ShapeDtypeStruct((M_pad, C_pad), x.dtype),
        grid_spec=pltpu.PrefetchScalarGridSpec(
            num_scalar_prefetch=0,
            grid=(n_m, n_h),
            in_specs=[
                pl.BlockSpec((TM, C_pad), lambda i, h: (i, 0)),   # x tile
                pl.BlockSpec((C_pad, TH), lambda i, h: (0, h)),   # W1 tile
                pl.BlockSpec((1, TH), lambda i, h: (0, h)),       # b1 tile
                pl.BlockSpec((TH, C_pad), lambda i, h: (h, 0)),   # W2 tile
                pl.BlockSpec((1, C_pad), lambda i, h: (0, 0)),    # b2 (resident)
            ],
            out_specs=pl.BlockSpec((TM, C_pad), lambda i, h: (i, 0)),
            scratch_shapes=[pltpu.VMEM((TM, C_pad), jnp.float32)],
        ),
        compiler_params=pltpu.CompilerParams(
            dimension_semantics=("parallel", "arbitrary"),
            vmem_limit_bytes=vmem_limit,
        ),
        cost_estimate=cost,
    )(x2d, w1, b1_2d, w2, b2_2d)

    return out[:M, :C].reshape(B, T, C)


def mlp_reference(x, w1, b1, w2, b2):
    h = jnp.einsum("btc,ch->bth", x, w1) + b1
    c = math.sqrt(2.0 / math.pi)
    g = 0.5 * h * (1.0 + jnp.tanh(c * (h + 0.044715 * h ** 3)))
    return jnp.einsum("bth,hc->btc", g, w2) + b2


if __name__ == "__main__":
    # GPTConfig(n_embd=64, block_size=64); input mirrors torch.ones(1, 64, 64).
    B, T, C = 1, 64, 64
    H = 4 * C

    key = jax.random.PRNGKey(0)
    k1, k2, k3, k4 = jax.random.split(key, 4)

    # Deterministic synthetic parameters (uniform, PyTorch-Linear-like scale).
    bound_fc = 1.0 / math.sqrt(C)
    bound_proj = 1.0 / math.sqrt(H)
    w1 = jax.random.uniform(k1, (C, H), jnp.float32, -bound_fc, bound_fc)
    b1 = jax.random.uniform(k2, (H,), jnp.float32, -bound_fc, bound_fc)
    w2 = jax.random.uniform(k3, (H, C), jnp.float32, -bound_proj, bound_proj)
    b2 = jax.random.uniform(k4, (C,), jnp.float32, -bound_proj, bound_proj)

    x = jnp.ones((B, T, C), jnp.float32)

    y = jax.block_until_ready(mlp_pallas(x, w1, b1, w2, b2))
    y_ref = mlp_reference(x, w1, b1, w2, b2)

    assert y.shape == (B, T, C)
    assert jnp.allclose(y, y_ref, atol=1e-4, rtol=1e-4), "mismatch vs reference"
    print("KERNEL_OK")
</pallas_src>

<mosaic_0001>
module attributes {stable_mosaic.version = 11 : i64} {
  func.func @mlp_kernel(%arg0: i32, %arg1: i32, %arg2: memref<64x128xf32, #tpu.memory_space<vmem>>, %arg3: memref<128x256xf32, #tpu.memory_space<vmem>>, %arg4: memref<1x256xf32, #tpu.memory_space<vmem>>, %arg5: memref<256x128xf32, #tpu.memory_space<vmem>>, %arg6: memref<1x128xf32, #tpu.memory_space<vmem>>, %arg7: memref<64x128xf32, #tpu.memory_space<vmem>>, %arg8: memref<64x128xf32, #tpu.memory_space<vmem>>) attributes {dimension_semantics = [#tpu.dimension_semantics<parallel>, #tpu.dimension_semantics<arbitrary>], iteration_bounds = array<i64: 1, 1>, scalar_prefetch = 0 : i64, scratch_operands = 1 : i64, tpu.core_type = #tpu.core_type<tc>, window_params = [{transform_indices = @transform_0, window_bounds = array<i64: 64, 128>}, {transform_indices = @transform_1, window_bounds = array<i64: 128, 256>}, {transform_indices = @transform_2, window_bounds = array<i64: 1, 256>}, {transform_indices = @transform_3, window_bounds = array<i64: 256, 128>}, {pipeline_mode = #tpu.pipeline_mode<synchronous>, transform_indices = @transform_4, window_bounds = array<i64: 1, 128>}, {transform_indices = @transform_5, window_bounds = array<i64: 64, 128>}]} {
    %c0_i32 = arith.constant 0 : i32
    %0 = arith.cmpi eq, %arg1, %c0_i32 : i32
    %1 = arith.extui %0 : i1 to i32
    %c0_i32_0 = arith.constant 0 : i32
    %2 = arith.cmpi ne, %1, %c0_i32_0 : i32
    scf.if %2 {
      %cst_19 = arith.constant 0.000000e+00 : f32
      %30 = vector.broadcast %cst_19 : f32 to vector<64x128xf32>
      %c0_20 = arith.constant 0 : index
      %c0_21 = arith.constant 0 : index
      %31 = vector.load %arg8[%c0_20, %c0_21] : memref<64x128xf32, #tpu.memory_space<vmem>>, vector<64x128xf32>
      tpu.vector_store %arg8[%c0_20, %c0_21], %30 {strides = array<i32>} : memref<64x128xf32, #tpu.memory_space<vmem>>, vector<64x128xf32>,
    } else {
    }
    %c0 = arith.constant 0 : index
    %c0_1 = arith.constant 0 : index
    %3 = vector.load %arg2[%c0, %c0_1] : memref<64x128xf32, #tpu.memory_space<vmem>>, vector<64x128xf32>
    %c0_2 = arith.constant 0 : index
    %c0_3 = arith.constant 0 : index
    %4 = vector.load %arg3[%c0_2, %c0_3] : memref<128x256xf32, #tpu.memory_space<vmem>>, vector<128x256xf32>
    %cst = arith.constant dense<0.000000e+00> : vector<64x256xf32>
    %5 = tpu.matmul %3, %4, %cst {dimension_numbers = #tpu.dot_dimension_numbers<[1], [0], [0], [1], [0, 0, 1, 1], [], []>} : vector<64x128xf32>, vector<128x256xf32>, vector<64x256xf32> -> vector<64x256xf32>
    %c0_4 = arith.constant 0 : index
    %c0_5 = arith.constant 0 : index
    %6 = vector.load %arg4[%c0_4, %c0_5] : memref<1x256xf32, #tpu.memory_space<vmem>>, vector<1x256xf32>
    %7 = vector.broadcast %6 : vector<1x256xf32> to vector<64x256xf32>
    %8 = arith.addf %5, %7 : vector<64x256xf32>
    %cst_6 = arith.constant 5.000000e-01 : f32
    %9 = vector.broadcast %cst_6 : f32 to vector<64x256xf32>
    %10 = arith.mulf %9, %8 : vector<64x256xf32>
    %11 = arith.mulf %8, %8 : vector<64x256xf32>
    %cst_7 = arith.constant 4.471500e-02 : f32
    %12 = vector.broadcast %cst_7 : f32 to vector<64x256xf32>
    %13 = arith.mulf %12, %11 : vector<64x256xf32>
    %14 = arith.mulf %13, %8 : vector<64x256xf32>
    %15 = arith.addf %8, %14 : vector<64x256xf32>
    %cst_8 = arith.constant 0.797884583 : f32
    %16 = vector.broadcast %cst_8 : f32 to vector<64x256xf32>
    %17 = arith.mulf %16, %15 : vector<64x256xf32>
    %18 = math.tanh %17 : vector<64x256xf32>
    %cst_9 = arith.constant 1.000000e+00 : f32
    %19 = vector.broadcast %cst_9 : f32 to vector<64x256xf32>
    %20 = arith.addf %19, %18 : vector<64x256xf32>
    %21 = arith.mulf %10, %20 : vector<64x256xf32>
    %c0_10 = arith.constant 0 : index
    %c0_11 = arith.constant 0 : index
    %22 = vector.load %arg8[%c0_10, %c0_11] : memref<64x128xf32, #tpu.memory_space<vmem>>, vector<64x128xf32>
    %c0_12 = arith.constant 0 : index
    %c0_13 = arith.constant 0 : index
    %23 = vector.load %arg5[%c0_12, %c0_13] : memref<256x128xf32, #tpu.memory_space<vmem>>, vector<256x128xf32>
    %cst_14 = arith.constant dense<0.000000e+00> : vector<64x128xf32>
    %24 = tpu.matmul %21, %23, %cst_14 {dimension_numbers = #tpu.dot_dimension_numbers<[1], [0], [0], [1], [0, 0, 1, 1], [], []>} : vector<64x256xf32>, vector<256x128xf32>, vector<64x128xf32> -> vector<64x128xf32>
    %25 = arith.addf %22, %24 : vector<64x128xf32>
    %c0_15 = arith.constant 0 : index
    %c0_16 = arith.constant 0 : index
    %26 = vector.load %arg8[%c0_15, %c0_16] : memref<64x128xf32, #tpu.memory_space<vmem>>, vector<64x128xf32>
    tpu.vector_store %arg8[%c0_15, %c0_16], %25 {strides = array<i32>} : memref<64x128xf32, #tpu.memory_space<vmem>>, vector<64x128xf32>,
    %c0_i32_17 = arith.constant 0 : i32
    %27 = arith.cmpi eq, %arg1, %c0_i32_17 : i32
    %28 = arith.extui %27 : i1 to i32
    %c0_i32_18 = arith.constant 0 : i32
    %29 = arith.cmpi ne, %28, %c0_i32_18 : i32
    scf.if %29 {
      %c0_19 = arith.constant 0 : index
      %c0_20 = arith.constant 0 : index
      %30 = vector.load %arg8[%c0_19, %c0_20] : memref<64x128xf32, #tpu.memory_space<vmem>>, vector<64x128xf32>
      %c0_21 = arith.constant 0 : index
      %c0_22 = arith.constant 0 : index
      %31 = vector.load %arg6[%c0_21, %c0_22] : memref<1x128xf32, #tpu.memory_space<vmem>>, vector<1x128xf32>
      %32 = vector.broadcast %31 : vector<1x128xf32> to vector<64x128xf32>
      %33 = arith.addf %30, %32 : vector<64x128xf32>
      %c0_23 = arith.constant 0 : index
      %c0_24 = arith.constant 0 : index
      %34 = vector.load %arg7[%c0_23, %c0_24] : memref<64x128xf32, #tpu.memory_space<vmem>>, vector<64x128xf32>
      tpu.vector_store %arg7[%c0_23, %c0_24], %33 {strides = array<i32>} : memref<64x128xf32, #tpu.memory_space<vmem>>, vector<64x128xf32>,
    } else {
    }
    return
  }
  func.func @transform_0(%arg0: i32, %arg1: i32) -> (i32, i32) {
    %c0_i32 = arith.constant 0 : i32
    %c0_i32_0 = arith.constant 0 : i32
    return %arg0, %c0_i32 : i32, i32
  }
  func.func @transform_1(%arg0: i32, %arg1: i32) -> (i32, i32) {
    %c0_i32 = arith.constant 0 : i32
    %c0_i32_0 = arith.constant 0 : i32
    return %c0_i32, %arg1 : i32, i32
  }
  func.func @transform_2(%arg0: i32, %arg1: i32) -> (i32, i32) {
    %c0_i32 = arith.constant 0 : i32
    %c0_i32_0 = arith.constant 0 : i32
    return %c0_i32, %arg1 : i32, i32
  }
  func.func @transform_3(%arg0: i32, %arg1: i32) -> (i32, i32) {
    %c0_i32 = arith.constant 0 : i32
    %c0_i32_0 = arith.constant 0 : i32
    return %arg1, %c0_i32 : i32, i32
  }
  func.func @transform_4(%arg0: i32, %arg1: i32) -> (i32, i32) {
    %c0_i32 = arith.constant 0 : i32
    %c0_i32_0 = arith.constant 0 : i32
    %c0_i32_1 = arith.constant 0 : i32
    return %c0_i32, %c0_i32_0 : i32, i32
  }
  func.func @transform_5(%arg0: i32, %arg1: i32) -> (i32, i32) {
    %c0_i32 = arith.constant 0 : i32
    %c0_i32_0 = arith.constant 0 : i32
    return %arg0, %c0_i32 : i32, i32
  }
}

</mosaic_0001>

<bundles_post_ra>
// kernel: tpu_custom_call.1
= control target key start
LH: loop header
LB: loop body
LE: loop exit
PB: predicated region body
PF: predicated region fallthrough
CT: control target
= control target key end

     0   :  { %10 = vsyncpa [#allocation4], 0  ;;  %s986_s0 = inlined_call_operand.hbm [shape: f32[64,128], index: 0, kind: input, shape index: {}]   ;;  %s987_s1 = inlined_call_operand.hbm [shape: f32[128,256], index: 1, kind: input, shape index: {}]   ;;  %s988_s2 = inlined_call_operand.vmem [shape: f32[1,256], index: 2, kind: input, shape index: {}]   ;;  %s989_s3 = inlined_call_operand.hbm [shape: f32[256,128], index: 3, kind: input, shape index: {}]   ;;  %s990_s4 = inlined_call_operand.vmem [shape: f32[1,128], index: 4, kind: input, shape index: {}]   ;;  %s991_s5 = inlined_call_operand.hbm [shape: f32[64,128], index: 5, kind: output, shape index: {}]  }
   0x1   :  { %11 = vsyncpa [#allocation7], 0 }
   0x2   :  { %12 = vsyncpa [#allocation5], 0  ;;  %s780_s18 = smov [#allocation6]  }
   0x3   :  { %s30_s19 = sshll.u32 %s780_s18, 4  ;;  %s31_s19 = int_to_ptr.vmem [resolvable:$true] %s30_s19 }
   0x4   :  { %s702_s20 = scalar_lea.vmem %s31_s19, 4096  ;;  %p707_p1 = scmp.lt.s32.totalorder %s31_s19, %s31_s19 }
   0x5   :  { %p703_p0 = scmp.ne.s32.totalorder %s31_s19, %s702_s20  ;;  %p708_p2 = scmp.lt.s32.totalorder %s702_s20, %s702_s20 }
   0x7   :  { %p709_p3 = por %p708_p2, %p707_p1 }
   0x9   :  { %p710_p4 = pnand %p709_p3, %p703_p0 }
   0xb   :  { %713 = shalt.err (!%p710_p4)
}
   0xc   :  { %s781_s21 = smov 256   ;;  %s782_s22 = smov 16  }
   0xd   :  { %36 = dma.hbm_to_vmem [thread:$0]  %s987_s1, 4096, %s31_s19, [#allocation7], %s781_s21, %s781_s21, %s782_s22  }
   0xe   :  { %s783_s25 = smov [#allocation3]  }
   0xf   :  { %s18_s26 = sshll.u32 %s783_s25, 4  ;;  %s19_s26 = int_to_ptr.vmem [resolvable:$true] %s18_s26 }
  0x10   :  { %s722_s27 = scalar_lea.vmem %s19_s26, 1024  ;;  %p727_p6 = scmp.lt.s32.totalorder %s19_s26, %s19_s26 }
  0x11   :  { %p723_p5 = scmp.ne.s32.totalorder %s19_s26, %s722_s27  ;;  %p728_p7 = scmp.lt.s32.totalorder %s722_s27, %s722_s27 }
  0x13   :  { %p729_p8 = por %p728_p7, %p727_p6 }
  0x15   :  { %p730_p9 = pnand %p729_p8, %p723_p5 }
  0x17   :  { %733 = shalt.err (!%p730_p9)
}
  0x18   :  { %s784_s28 = smov 128   ;;  %s785_s29 = smov 8  }
  0x19   :  { %24 = dma.hbm_to_vmem [thread:$0]  %s986_s0, 1024, %s19_s26, [#allocation4], %s784_s28, %s784_s28, %s785_s29  }
  0x1a   :  { %s786_s1 = smov [#allocation8]  }
  0x1b   :  { %s44_s7 = sshll.u32 %s786_s1, 4  ;;  %s45_s7 = int_to_ptr.vmem [resolvable:$true] %s44_s7 }
  0x1c   :  { %s742_s8 = scalar_lea.vmem %s45_s7, 4096  ;;  %p747_p11 = scmp.lt.s32.totalorder %s45_s7, %s45_s7 }
  0x1d   :  { %p743_p10 = scmp.ne.s32.totalorder %s45_s7, %s742_s8  ;;  %p748_p12 = scmp.lt.s32.totalorder %s742_s8, %s742_s8 }
  0x1f   :  { %p749_p13 = por %p748_p12, %p747_p11 }
  0x21   :  { %p750_p0 = pnand %p749_p13, %p743_p10 }
  0x23   :  { %753 = shalt.err (!%p750_p0)
}
  0x24   :  { %50 = dma.hbm_to_vmem [thread:$0]  %s989_s3, 4096, %s45_s7, [#allocation7], %s784_s28, %s784_s28, %s785_s29  }
  0x25   :  { %774 = dma.done.wait [#allocation4], 1024  }
  0x26   :  { %775 = vsyncadd [#allocation4], 4294966272 }
  0x27   :  { %776 = dma.done.wait [#allocation7], 8192  }
  0x28   :  { %777 = vsyncadd [#allocation7], 4294959104  ;;  %v787_v0 = vmov 0.0   ;;  %v113_v1 = vld [vmem:[#allocation6 + $0xf8] sm:$0xff]  ;;  %v112_v2 = vld [vmem:[#allocation6 + $0xf0] sm:$0xff] }
  0x29   :  { %190 = vmatprep.mubr.f32.mxu0 %v787_v0  ;;  %v111_v3 = vld [vmem:[#allocation6 + $0xe8] sm:$0xff]  ;;  %126 = vmatprep.subr.mxu0 %v113_v1  ;;  %v110_v4 = vld [vmem:[#allocation6 + $0xe0] sm:$0xff]  ;;  %v109_v5 = vld [vmem:[#allocation6 + $0xd8] sm:$0xff] }
  0x2a   :  { %127 = vmatpush1.msra.mxu0 %v112_v2  ;;  %v108_v6 = vld [vmem:[#allocation6 + $0xd0] sm:$0xff]  ;;  %v107_v7 = vld [vmem:[#allocation6 + $0xc8] sm:$0xff]  ;;  %v106_v8 = vld [vmem:[#allocation6 + $0xc0] sm:$0xff] }
  0x2b   :  { %128 = vmatprep.subr.mxu0 %v111_v3  ;;  %v105_v9 = vld [vmem:[#allocation6 + $0xb8] sm:$0xff]  ;;  %v104_v10 = vld [vmem:[#allocation6 + $0xb0] sm:$0xff]  ;;  %v103_v11 = vld [vmem:[#allocation6 + $0xa8] sm:$0xff] }
  0x2c   :  { %129 = vmatpush1.msra.mxu0 %v110_v4  ;;  %v102_v12 = vld [vmem:[#allocation6 + $0xa0] sm:$0xff]  ;;  %v101_v13 = vld [vmem:[#allocation6 + $0x98] sm:$0xff]  ;;  %v100_v14 = vld [vmem:[#allocation6 + $0x90] sm:$0xff] }
  0x2d   :  { %130 = vmatprep.subr.mxu0 %v109_v5  ;;  %v99_v15 = vld [vmem:[#allocation6 + $0x88] sm:$0xff]  ;;  %v98_v16 = vld [vmem:[#allocation6 + $0x80] sm:$0xff]  ;;  %v97_v17 = vld [vmem:[#allocation6 + $0x78] sm:$0xff] }
  0x2e   :  { %131 = vmatpush1.msra.mxu0 %v108_v6  ;;  %v96_v18 = vld [vmem:[#allocation6 + $0x70] sm:$0xff]  ;;  %v95_v19 = vld [vmem:[#allocation6 + $0x68] sm:$0xff]  ;;  %v94_v20 = vld [vmem:[#allocation6 + $0x60] sm:$0xff] }
  0x2f   :  { %132 = vmatprep.subr.mxu0 %v107_v7  ;;  %v93_v21 = vld [vmem:[#allocation6 + $0x58] sm:$0xff]  ;;  %v92_v22 = vld [vmem:[#allocation6 + $0x50] sm:$0xff]  ;;  %v91_v23 = vld [vmem:[#allocation6 + $0x48] sm:$0xff] }
  0x30   :  { %133 = vmatpush1.msra.mxu0 %v106_v8  ;;  %v90_v24 = vld [vmem:[#allocation6 + $0x40] sm:$0xff]  ;;  %v89_v25 = vld [vmem:[#allocation6 + $0x38] sm:$0xff]  ;;  %v88_v26 = vld [vmem:[#allocation6 + $0x30] sm:$0xff] }
  0x31   :  { %134 = vmatprep.subr.mxu0 %v105_v9  ;;  %v87_v27 = vld [vmem:[#allocation6 + $0x28] sm:$0xff]  ;;  %v86_v28 = vld [vmem:[#allocation6 + $0x20] sm:$0xff]  ;;  %v85_v29 = vld [vmem:[#allocation6 + $0x18] sm:$0xff]  ;;  %v116_v9 = vlaneseq }
  0x32   :  { %135 = vmatpush1.msra.mxu0 %v104_v10  ;;  %v84_v30 = vld [vmem:[#allocation6 + $0x10] sm:$0xff]  ;;  %v83_v31 = vld [vmem:[#allocation6 + $0x8] sm:$0xff]  ;;  %v82_v32 = vld [vmem:[#allocation6] sm:$0xff] }
  0x33   :  { %136 = vmatprep.subr.mxu0 %v103_v11  ;;  %v74_v33 = vld [vmem:[#allocation3] sm:$0xff]  ;;  %v75_v34 = vld [vmem:[#allocation3 + $0x8] sm:$0xff]  ;;  %v76_v35 = vld [vmem:[#allocation3 + $0x10] sm:$0xff]  ;;  %v117_v10 = vshrl.u32 %v116_v9, 7 }
  0x34   :  { %137 = vmatpush1.msra.mxu0 %v102_v12  ;;  %v77_v36 = vld [vmem:[#allocation3 + $0x18] sm:$0xff]  ;;  %v78_v37 = vld [vmem:[#allocation3 + $0x20] sm:$0xff]  ;;  %v79_v38 = vld [vmem:[#allocation3 + $0x28] sm:$0xff] }
  0x35   :  { %138 = vmatprep.subr.mxu0 %v101_v13  ;;  %v80_v39 = vld [vmem:[#allocation3 + $0x30] sm:$0xff]  ;;  %v81_v40 = vld [vmem:[#allocation3 + $0x38] sm:$0xff]  ;;  %v420_v45 = vld [vmem:[#allocation8 + $0xe8] sm:$0xff]  ;;  %v118_v11 = vsub.s32 0, %v117_v10  ;;  %v122_v13 = vsub.s32 1, %v117_v10 }
  0x36   :  { %139 = vmatpush1.msra.mxu0 %v100_v14  ;;  %v422_v41 = vld [vmem:[#allocation8 + $0xf8] sm:$0xff]  ;;  %v421_v43 = vld [vmem:[#allocation8 + $0xf0] sm:$0xff]  ;;  %v404_v46 = vld [vmem:[#allocation8 + $0x68] sm:$0xff] }
  0x37   :  { %140 = vmatprep.subr.mxu0 %v99_v15  ;;  %597 = vmatprep.subr.mxu1 %v422_v41  ;;  %v406_v42 = vld [vmem:[#allocation8 + $0x78] sm:$0xff]  ;;  %v405_v44 = vld [vmem:[#allocation8 + $0x70] sm:$0xff]  ;;  %v419_v47 = vld [vmem:[#allocation8 + $0xe0] sm:$0xff] }
  0x38   :  { %141 = vmatpush1.msra.mxu0 %v98_v16  ;;  %598 = vmatpush3.msra.mxu1 %v406_v42  ;;  %v403_v48 = vld [vmem:[#allocation8 + $0x60] sm:$0xff]  ;;  %v418_v49 = vld [vmem:[#allocation8 + $0xd8] sm:$0xff]  ;;  %v417_v51 = vld [vmem:[#allocation8 + $0xd0] sm:$0xff] }
  0x39   :  { %142 = vmatprep.subr.mxu0 %v97_v17  ;;  %599 = vmatprep.subr.mxu1 %v421_v43  ;;  %v402_v50 = vld [vmem:[#allocation8 + $0x58] sm:$0xff]  ;;  %v401_v52 = vld [vmem:[#allocation8 + $0x50] sm:$0xff]  ;;  %v416_v53 = vld [vmem:[#allocation8 + $0xc8] sm:$0xff] }
  0x3a   :  { %143 = vmatpush1.msra.mxu0 %v96_v18  ;;  %600 = vmatpush3.msra.mxu1 %v405_v44  ;;  %v400_v54 = vld [vmem:[#allocation8 + $0x48] sm:$0xff]  ;;  %v415_v55 = vld [vmem:[#allocation8 + $0xc0] sm:$0xff]  ;;  %v414_v57 = vld [vmem:[#allocation8 + $0xb8] sm:$0xff] }
  0x3b   :  { %144 = vmatprep.subr.mxu0 %v95_v19  ;;  %601 = vmatprep.subr.mxu1 %v420_v45  ;;  %v399_v56 = vld [vmem:[#allocation8 + $0x40] sm:$0xff]  ;;  %v398_v58 = vld [vmem:[#allocation8 + $0x38] sm:$0xff]  ;;  %v413_v59 = vld [vmem:[#allocation8 + $0xb0] sm:$0xff] }
  0x3c   :  { %145 = vmatpush1.msra.mxu0 %v94_v20  ;;  %602 = vmatpush3.msra.mxu1 %v404_v46  ;;  %v397_v60 = vld [vmem:[#allocation8 + $0x30] sm:$0xff]  ;;  %v412_v61 = vld [vmem:[#allocation8 + $0xa8] sm:$0xff]  ;;  %v411_v63 = vld [vmem:[#allocation8 + $0xa0] sm:$0xff] }
  0x3d   :  { %146 = vmatprep.subr.mxu0 %v93_v21  ;;  %603 = vmatprep.subr.mxu1 %v419_v47  ;;  %v396_v62 = vld [vmem:[#allocation8 + $0x28] sm:$0xff]  ;;  %v410_v1 = vld [vmem:[#allocation8 + $0x98] sm:$0xff]  ;;  %v409_v3 = vld [vmem:[#allocation8 + $0x90] sm:$0xff] }
  0x3e   :  { %147 = vmatpush1.msra.mxu0 %v92_v22  ;;  %604 = vmatpush3.msra.mxu1 %v403_v48  ;;  %v394_v2 = vld [vmem:[#allocation8 + $0x18] sm:$0xff]  ;;  %v393_v4 = vld [vmem:[#allocation8 + $0x10] sm:$0xff]  ;;  %v408_v5 = vld [vmem:[#allocation8 + $0x88] sm:$0xff] }
  0x3f   :  { %148 = vmatprep.subr.mxu0 %v91_v23  ;;  %605 = vmatprep.subr.mxu1 %v418_v49  ;;  %v392_v6 = vld [vmem:[#allocation8 + $0x8] sm:$0xff]  ;;  %v407_v7 = vld [vmem:[#allocation8 + $0x80] sm:$0xff] }
  0x40   :  { %149 = vmatpush1.msra.mxu0 %v90_v24  ;;  %606 = vmatpush3.msra.mxu1 %v402_v50  ;;  %v391_v8 = vld [vmem:[#allocation8] sm:$0xff] }
  0x41   :  { %150 = vmatprep.subr.mxu0 %v89_v25  ;;  %607 = vmatprep.subr.mxu1 %v417_v51  ;;  %v114_v12 = vld [vmem:[%s988_s2] sm:$0x3] }
  0x42   :  { %151 = vmatpush1.msra.mxu0 %v88_v26  ;;  %608 = vmatpush3.msra.mxu1 %v401_v52  ;;  %v845_v14 = vrot.slane %v114_v12, %v118_v11  ;;  %v847_v15 = vrot.slane %v114_v12, %v122_v13 }
  0x43   :  { %152 = vmatprep.subr.mxu0 %v87_v27  ;;  %609 = vmatprep.subr.mxu1 %v416_v53 }
  0x44   :  { %153 = vmatpush1.msra.mxu0 %v86_v28  ;;  %610 = vmatpush3.msra.mxu1 %v400_v54 }
  0x45   :  { %154 = vmatprep.subr.mxu0 %v85_v29  ;;  %611 = vmatprep.subr.mxu1 %v415_v55 }
  0x46   :  { %155 = vmatpush1.msra.mxu0 %v84_v30  ;;  %612 = vmatpush3.msra.mxu1 %v399_v56 }
  0x47   :  { %156 = vmatprep.subr.mxu0 %v83_v31  ;;  %613 = vmatprep.subr.mxu1 %v414_v57 }
  0x48   :  { %157 = vmatpush1.msra.mxu0 %v82_v32  ;;  %614 = vmatpush3.msra.mxu1 %v398_v58 }
  0x49   :  { %191 = vmatmul.mubr.f32.vlgmr.msra.gmra.mxu0 %v74_v33  ;;  %615 = vmatprep.subr.mxu1 %v413_v59 }
  0x4a   :  { %196 = vmatprep.mubr.f32.mxu0 %v787_v0  ;;  %616 = vmatpush3.msra.mxu1 %v397_v60 }
  0x4b   :  { %617 = vmatprep.subr.mxu1 %v412_v61 }
  0x4c   :  { %618 = vmatpush3.msra.mxu1 %v396_v62 }
  0x4d   :  { %197 = vmatmul.mubr.f32.gmra.mxu0 %v75_v34  ;;  %619 = vmatprep.subr.mxu1 %v411_v63 }
  0x4e   :  { %202 = vmatprep.mubr.f32.mxu0 %v787_v0 }
  0x51   :  { %203 = vmatmul.mubr.f32.gmra.mxu0 %v76_v35 }
  0x52   :  { %208 = vmatprep.mubr.f32.mxu0 %v787_v0 }
  0x55   :  { %209 = vmatmul.mubr.f32.gmra.mxu0 %v77_v36 }
  0x56   :  { %214 = vmatprep.mubr.f32.mxu0 %v787_v0 }
  0x59   :  { %215 = vmatmul.mubr.f32.gmra.mxu0 %v78_v37 }
  0x5a   :  { %220 = vmatprep.mubr.f32.mxu0 %v787_v0 }
  0x5d   :  { %221 = vmatmul.mubr.f32.gmra.mxu0 %v79_v38 }
  0x5e   :  { %226 = vmatprep.mubr.f32.mxu0 %v787_v0 }
  0x61   :  { %227 = vmatmul.mubr.f32.gmra.mxu0 %v80_v39 }
  0x62   :  { %232 = vmatprep.mubr.f32.mxu0 %v787_v0  ;;  %v395_v0 = vld [vmem:[#allocation8 + $0x20] sm:$0xff] }
  0x63   :  { %620 = vmatpush3.msra.mxu1 %v395_v0 }
  0x64   :  { %621 = vmatprep.subr.mxu1 %v410_v1 }
  0x65   :  { %233 = vmatmul.mubr.f32.gmra.mxu0 %v81_v40  ;;  %622 = vmatpush3.msra.mxu1 %v394_v2 }
  0x66   :  { %623 = vmatprep.subr.mxu1 %v409_v3 }
  0x67   :  { %624 = vmatpush3.msra.mxu1 %v393_v4 }
  0x68   :  { %625 = vmatprep.subr.mxu1 %v408_v5 }
  0x69   :  { %626 = vmatpush3.msra.mxu1 %v392_v6 }
  0x6a   :  { %627 = vmatprep.subr.mxu1 %v407_v7 }
  0x6b   :  { %628 = vmatpush3.msra.mxu1 %v391_v8 }
 0x109   :  { %v192_v16 = vpop.f32.mrf.mxu0 }
 0x10a   :  { %v850_v17 = vadd.f32 %v192_v16, %v845_v14 }
 0x10b   :  { %v194_v18 = vpop.f32.mrf.mxu0 }
 0x10c   :  { %v255_v19 = vmul.f32 %v850_v17, %v850_v17  ;;  %v855_v20 = vadd.f32 %v194_v18, %v847_v15  ;;  %v239_v18 = vmul.f32 0.5, %v850_v17 }
 0x10d   :  { %v198_v21 = vpop.f32.mrf.mxu0 }
 0x10e   :  { %v271_v22 = vmul.f32 0.044715, %v255_v19  ;;  %v256_v23 = vmul.f32 %v855_v20, %v855_v20  ;;  %v860_v24 = vadd.f32 %v198_v21, %v845_v14 }
 0x10f   :  { %v200_v25 = vpop.f32.mrf.mxu0 }
 0x110   :  { %v287_v26 = vmul.f32 %v271_v22, %v850_v17  ;;  %v272_v27 = vmul.f32 0.044715, %v256_v23  ;;  %v257_v28 = vmul.f32 %v860_v24, %v860_v24  ;;  %v866_v29 = vadd.f32 %v200_v25, %v847_v15 }
 0x111   :  { %v204_v30 = vpop.f32.mrf.mxu0 }
 0x112   :  { %v303_v31 = vadd.f32 %v287_v26, %v850_v17  ;;  %v273_v32 = vmul.f32 0.044715, %v257_v28  ;;  %v258_v33 = vmul.f32 %v866_v29, %v866_v29  ;;  %v872_v34 = vadd.f32 %v204_v30, %v845_v14 }
 0x113   :  { %v206_v35 = vpop.f32.mrf.mxu0  ;;  %v288_v36 = vmul.f32 %v272_v27, %v855_v20  ;;  %v240_v28 = vmul.f32 0.5, %v855_v20 }
 0x114   :  { %v319_v37 = vmul.f32 0.7978846, %v303_v31  ;;  %v289_v38 = vmul.f32 %v273_v32, %v860_v24  ;;  %v274_v39 = vmul.f32 0.044715, %v258_v33  ;;  %v259_v40 = vmul.f32 %v872_v34, %v872_v34 }
 0x115   :  { %v879_v41 = vadd.f32 %v206_v35, %v847_v15  ;;  %v210_v42 = vpop.f32.mrf.mxu0  ;;  %v304_v43 = vadd.f32 %v288_v36, %v855_v20 }
 0x116   :  { %v305_v44 = vadd.f32 %v289_v38, %v860_v24  ;;  %v290_v45 = vmul.f32 %v274_v39, %v866_v29  ;;  %v275_v46 = vmul.f32 0.044715, %v259_v40  ;;  %v885_v47 = vadd.f32 %v210_v42, %v845_v14 }
 0x117   :  { %v260_v48 = vmul.f32 %v879_v41, %v879_v41  ;;  %v212_v49 = vpop.f32.mrf.mxu0  ;;  %v320_v50 = vmul.f32 0.7978846, %v304_v43  ;;  %662 = vtanh.f32 %v319_v37  ;;  %v241_v37 = vmul.f32 0.5, %v860_v24 }
 0x118   :  { %v321_v51 = vmul.f32 0.7978846, %v305_v44  ;;  %v306_v52 = vadd.f32 %v290_v45, %v866_v29  ;;  %v291_v53 = vmul.f32 %v275_v46, %v872_v34  ;;  %v261_v54 = vmul.f32 %v885_v47, %v885_v47 }
 0x119   :  { %v276_v55 = vmul.f32 0.044715, %v260_v48  ;;  %v894_v56 = vadd.f32 %v212_v49, %v847_v15  ;;  %v216_v57 = vpop.f32.mrf.mxu0  ;;  %664 = vtanh.f32 %v320_v50 }
 0x11a   :  { %v322_v58 = vmul.f32 0.7978846, %v306_v52  ;;  %v307_v59 = vadd.f32 %v291_v53, %v872_v34  ;;  %v277_v60 = vmul.f32 0.044715, %v261_v54  ;;  %v898_v61 = vadd.f32 %v216_v57, %v845_v14 }
 0x11b   :  { %v292_v62 = vmul.f32 %v276_v55, %v879_v41  ;;  %v262_v63 = vmul.f32 %v894_v56, %v894_v56  ;;  %v218_v0 = vpop.f32.mrf.mxu0  ;;  %666 = vtanh.f32 %v321_v51 }
 0x11c   :  { %v323_v1 = vmul.f32 0.7978846, %v307_v59  ;;  %v293_v2 = vmul.f32 %v277_v60, %v885_v47  ;;  %v263_v3 = vmul.f32 %v898_v61, %v898_v61  ;;  %v907_v4 = vadd.f32 %v218_v0, %v847_v15 }
 0x11d   :  { %v308_v5 = vadd.f32 %v292_v62, %v879_v41  ;;  %v278_v6 = vmul.f32 0.044715, %v262_v63  ;;  %v222_v7 = vpop.f32.mrf.mxu0  ;;  %668 = vtanh.f32 %v322_v58 }
 0x11e   :  { %v309_v8 = vadd.f32 %v293_v2, %v885_v47  ;;  %v279_v9 = vmul.f32 0.044715, %v263_v3  ;;  %v264_v10 = vmul.f32 %v907_v4, %v907_v4  ;;  %v914_v11 = vadd.f32 %v222_v7, %v845_v14 }
 0x11f   :  { %v324_v12 = vmul.f32 0.7978846, %v308_v5  ;;  %v294_v13 = vmul.f32 %v278_v6, %v894_v56  ;;  %v224_v16 = vpop.f32.mrf.mxu0  ;;  %670 = vtanh.f32 %v323_v1 }
 0x120   :  { %v325_v19 = vmul.f32 0.7978846, %v309_v8  ;;  %v295_v21 = vmul.f32 %v279_v9, %v898_v61  ;;  %v280_v22 = vmul.f32 0.044715, %v264_v10  ;;  %v265_v23 = vmul.f32 %v914_v11, %v914_v11 }
 0x121   :  { %v310_v25 = vadd.f32 %v294_v13, %v894_v56  ;;  %v923_v26 = vadd.f32 %v224_v16, %v847_v15  ;;  %v228_v27 = vpop.f32.mrf.mxu0  ;;  %672 = vtanh.f32 %v324_v12 }
 0x122   :  { %v311_v30 = vadd.f32 %v295_v21, %v898_v61  ;;  %v296_v17 = vmul.f32 %v280_v22, %v907_v4  ;;  %v281_v31 = vmul.f32 0.044715, %v265_v23  ;;  %v929_v32 = vadd.f32 %v228_v27, %v845_v14 }
 0x123   :  { %v326_v33 = vmul.f32 0.7978846, %v310_v25  ;;  %v266_v35 = vmul.f32 %v923_v26, %v923_v26  ;;  %v230_v36 = vpop.f32.mrf.mxu0  ;;  %674 = vtanh.f32 %v325_v19 }
 0x124   :  { %v663_v38 = vpop.eup %662  ;;  %v327_v39 = vmul.f32 0.7978846, %v311_v30  ;;  %v312_v20 = vadd.f32 %v296_v17, %v907_v4  ;;  %v297_v40 = vmul.f32 %v281_v31, %v914_v11  ;;  %v267_v42 = vmul.f32 %v929_v32, %v929_v32 }
 0x125   :  { %v282_v43 = vmul.f32 0.044715, %v266_v35  ;;  %v939_v44 = vadd.f32 %v230_v36, %v847_v15  ;;  %v234_v45 = vpop.f32.mrf.mxu0  ;;  %v351_v46 = vadd.f32 1.0, %v663_v38  ;;  %676 = vtanh.f32 %v326_v33 }
 0x126   :  { %v665_v48 = vpop.eup %664  ;;  %v328_v49 = vmul.f32 0.7978846, %v312_v20  ;;  %v313_v24 = vadd.f32 %v297_v40, %v914_v11  ;;  %v283_v50 = vmul.f32 0.044715, %v267_v42  ;;  %v943_v51 = vadd.f32 %v234_v45, %v845_v14 }
 0x127   :  { %v298_v52 = vmul.f32 %v282_v43, %v923_v26  ;;  %v268_v53 = vmul.f32 %v939_v44, %v939_v44  ;;  %v236_v54 = vpop.f32.mrf.mxu0  ;;  %v352_v55 = vadd.f32 1.0, %v665_v48  ;;  %v367_v57 = vmul.f32 %v351_v46, %v239_v18 }
 0x128   :  { %v667_v58 = vpop.eup %666  ;;  %v329_v59 = vmul.f32 0.7978846, %v313_v24  ;;  %v299_v60 = vmul.f32 %v283_v50, %v929_v32  ;;  %v269_v62 = vmul.f32 %v943_v51, %v943_v51  ;;  %v952_v63 = vadd.f32 %v236_v54, %v847_v15 }
 0x129   :  { %v314_v14 = vadd.f32 %v298_v52, %v923_v26  ;;  %v284_v0 = vmul.f32 0.044715, %v268_v53  ;;  %v368_v1 = vmul.f32 %v352_v55, %v240_v28  ;;  %v353_v2 = vadd.f32 1.0, %v667_v58 }
 0x12a   :  { %v669_v3 = vpop.eup %668  ;;  %v315_v5 = vadd.f32 %v299_v60, %v929_v32  ;;  %v285_v6 = vmul.f32 0.044715, %v269_v62  ;;  %v270_v7 = vmul.f32 %v952_v63, %v952_v63  ;;  %678 = vtanh.f32 %v328_v49 }
 0x12b   :  { %v330_v8 = vmul.f32 0.7978846, %v314_v14  ;;  %v300_v9 = vmul.f32 %v284_v0, %v939_v44  ;;  %487 = vmatprep.mubr.f32.mxu1 %v368_v1  ;;  %v242_v15 = vmul.f32 0.5, %v866_v29  ;;  %v354_v10 = vadd.f32 1.0, %v669_v3 }
 0x12c   :  { %v671_v12 = vpop.eup %670  ;;  %v331_v13 = vmul.f32 0.7978846, %v315_v5  ;;  %v301_v16 = vmul.f32 %v285_v6, %v943_v51  ;;  %v286_v18 = vmul.f32 0.044715, %v270_v7  ;;  %488 = vmatmul.mubr.f32.vlgmr.msra.gmra.mxu1 %v367_v57  ;;  %680 = vtanh.f32 %v327_v39 }
 0x12d   :  { %v316_v19 = vadd.f32 %v300_v9, %v939_v44  ;;  %v370_v21 = vmul.f32 %v354_v10, %v242_v15  ;;  %v369_v22 = vmul.f32 %v353_v2, %v241_v37  ;;  %682 = vtanh.f32 %v330_v8 }
 0x12e   :  { %v673_v23 = vpop.eup %672  ;;  %v317_v25 = vadd.f32 %v301_v16, %v943_v51  ;;  %v302_v27 = vmul.f32 %v286_v18, %v952_v63  ;;  %v355_v28 = vadd.f32 1.0, %v671_v12  ;;  %684 = vtanh.f32 %v329_v59 }
 0x12f   :  { %v332_v29 = vmul.f32 0.7978846, %v316_v19  ;;  %492 = vmatprep.mubr.f32.mxu1 %v370_v21  ;;  %v244_v30 = vmul.f32 0.5, %v879_v41  ;;  %v356_v17 = vadd.f32 1.0, %v673_v23  ;;  %v243_v36 = vmul.f32 0.5, %v872_v34 }
 0x130   :  { %v675_v31 = vpop.eup %674  ;;  %v333_v33 = vmul.f32 0.7978846, %v317_v25  ;;  %v318_v35 = vadd.f32 %v302_v27, %v952_v63  ;;  %493 = vmatmul.mubr.f32.gmra.mxu1 %v369_v22  ;;  %686 = vtanh.f32 %v331_v13  ;;  %v246_v42 = vmul.f32 0.5, %v894_v56  ;;  %v596_v13 = vld [vmem:[%s990_s4] ss:$0 sm:$0xff]  ;;  %s788_s4 = smov [#allocation9]  }
 0x131   :  { %v372_v37 = vmul.f32 %v356_v17, %v244_v30  ;;  %688 = vtanh.f32 %v332_v29  ;;  %v371_v20 = vmul.f32 %v355_v28, %v243_v36  ;;  %v357_v40 = vadd.f32 1.0, %v675_v31  ;;  %s583_s12 = sshll.u32 %s788_s4, 4  ;;  %s584_s12 = int_to_ptr.vmem [resolvable:$true] %s583_s12 }
 0x132   :  { %v677_v38 = vpop.eup %676  ;;  %v334_v39 = vmul.f32 0.7978846, %v318_v35  ;;  %690 = vtanh.f32 %v333_v33  ;;  %v245_v41 = vmul.f32 0.5, %v885_v47  ;;  %v248_v34 = vmul.f32 0.5, %v907_v4  ;;  %s754_s13 = scalar_lea.vmem %s584_s12, 1024  ;;  %p759_p2 = scmp.lt.s32.totalorder %s584_s12, %s584_s12 }
 0x133   :  { %497 = vmatprep.mubr.f32.mxu1 %v372_v37  ;;  %v358_v43 = vadd.f32 1.0, %v677_v38  ;;  %v247_v53 = vmul.f32 0.5, %v898_v61  ;;  %v250_v55 = vmul.f32 0.5, %v923_v26  ;;  %v249_v4 = vmul.f32 0.5, %v914_v11  ;;  %p755_p1 = scmp.ne.s32.totalorder %s584_s12, %s754_s13  ;;  %p760_p3 = scmp.lt.s32.totalorder %s754_s13, %s754_s13 }
 0x134   :  { %498 = vmatmul.mubr.f32.gmra.mxu1 %v371_v20  ;;  %692 = vtanh.f32 %v334_v39  ;;  %v373_v46 = vmul.f32 %v357_v40, %v245_v41  ;;  %v252_v14 = vmul.f32 0.5, %v939_v44  ;;  %v251_v26 = vmul.f32 0.5, %v929_v32 }
 0x135   :  { %v374_v45 = vmul.f32 %v358_v43, %v246_v42  ;;  %v254_v6 = vmul.f32 0.5, %v952_v63  ;;  %v253_v11 = vmul.f32 0.5, %v943_v51  ;;  %p761_p4 = por %p760_p3, %p759_p2 }
 0x137   :  { %v679_v48 = vpop.eup %678  ;;  %502 = vmatprep.mubr.f32.mxu1 %v374_v45  ;;  %p762_p5 = pnand %p761_p4, %p755_p1 }
 0x138   :  { %503 = vmatmul.mubr.f32.gmra.mxu1 %v373_v46  ;;  %v360_v49 = vadd.f32 1.0, %v679_v48 }
 0x139   :  { %v681_v24 = vpop.eup %680 }
 0x13a   :  { %v683_v50 = vpop.eup %682  ;;  %v376_v52 = vmul.f32 %v360_v49, %v248_v34  ;;  %v359_v56 = vadd.f32 1.0, %v681_v24 }
 0x13b   :  { %v685_v54 = vpop.eup %684  ;;  %v362_v57 = vadd.f32 1.0, %v683_v50 }
 0x13c   :  { %507 = vmatprep.mubr.f32.mxu1 %v376_v52  ;;  %v375_v47 = vmul.f32 %v359_v56, %v247_v53  ;;  %v361_v58 = vadd.f32 1.0, %v685_v54 }
 0x13d   :  { %v687_v59 = vpop.eup %686  ;;  %v378_v60 = vmul.f32 %v362_v57, %v250_v55 }
 0x13e   :  { %v689_v62 = vpop.eup %688  ;;  %508 = vmatmul.mubr.f32.gmra.mxu1 %v375_v47  ;;  %v377_v61 = vmul.f32 %v361_v58, %v249_v4  ;;  %v363_v2 = vadd.f32 1.0, %v687_v59 }
 0x13f   :  { %512 = vmatprep.mubr.f32.mxu1 %v378_v60  ;;  %v364_v0 = vadd.f32 1.0, %v689_v62  ;;  %v691_v1 = vpop.eup %690 }
 0x140   :  { %v379_v8 = vmul.f32 %v363_v2, %v251_v26  ;;  %v365_v15 = vadd.f32 1.0, %v691_v1 }
 0x141   :  { %v693_v3 = vpop.eup %692  ;;  %v380_v5 = vmul.f32 %v364_v0, %v252_v14 }
 0x142   :  { %513 = vmatmul.mubr.f32.gmra.mxu1 %v377_v61  ;;  %v366_v7 = vadd.f32 1.0, %v693_v3  ;;  %v381_v44 = vmul.f32 %v365_v15, %v253_v11 }
 0x143   :  { %517 = vmatprep.mubr.f32.mxu1 %v380_v5 }
 0x144   :  { %v382_v9 = vmul.f32 %v366_v7, %v254_v6 }
 0x146   :  { %518 = vmatmul.mubr.f32.gmra.mxu1 %v379_v8 }
 0x147   :  { %522 = vmatprep.mubr.f32.mxu1 %v382_v9 }
 0x14a   :  { %523 = vmatmul.mubr.f32.gmra.mxu1 %v381_v44 }
 0x1ec   :  { %v629_v10 = vpop.f32.mrf.mxu1 }
 0x1ee   :  { %v630_v12 = vpop.f32.mrf.mxu1 }
 0x1ef   :  { %v631_v32 = vadd.f32 %v630_v12, %v629_v10 }
 0x1f0   :  { %v632_v16 = vpop.f32.mrf.mxu1 }
 0x1f1   :  { %v562_v63 = vadd.f32 %v631_v32, %v596_v13 }
 0x1f2   :  { %v633_v18 = vpop.f32.mrf.mxu1 }
 0x1f3   :  { %570 = vst [vmem:[#allocation9] sm:$0xff] %v562_v63  ;;  %v634_v19 = vadd.f32 %v633_v18, %v632_v16 }
 0x1f4   :  { %v635_v21 = vpop.f32.mrf.mxu1 }
 0x1f5   :  { %v563_v22 = vadd.f32 %v634_v19, %v596_v13 }
 0x1f6   :  { %v636_v23 = vpop.f32.mrf.mxu1 }
 0x1f7   :  { %571 = vst [vmem:[#allocation9 + $0x8] sm:$0xff] %v563_v22  ;;  %v637_v51 = vadd.f32 %v636_v23, %v635_v21 }
 0x1f8   :  { %v638_v25 = vpop.f32.mrf.mxu1 }
 0x1f9   :  { %v564_v27 = vadd.f32 %v637_v51, %v596_v13 }
 0x1fa   :  { %v639_v28 = vpop.f32.mrf.mxu1 }
 0x1fb   :  { %572 = vst [vmem:[#allocation9 + $0x10] sm:$0xff] %v564_v27  ;;  %v640_v29 = vadd.f32 %v639_v28, %v638_v25 }
 0x1fd   :  { %v565_v30 = vadd.f32 %v640_v29, %v596_v13 }
 0x1fe   :  { %v641_v17 = vpop.f32.mrf.mxu1 }
 0x1ff   :  { %573 = vst [vmem:[#allocation9 + $0x18] sm:$0xff] %v565_v30 }
 0x200   :  { %v642_v31 = vpop.f32.mrf.mxu1 }
 0x201   :  { %v643_v33 = vadd.f32 %v642_v31, %v641_v17 }
 0x202   :  { %v644_v35 = vpop.f32.mrf.mxu1 }
 0x203   :  { %v566_v36 = vadd.f32 %v643_v33, %v596_v13 }
 0x204   :  { %v645_v37 = vpop.f32.mrf.mxu1 }
 0x205   :  { %574 = vst [vmem:[#allocation9 + $0x20] sm:$0xff] %v566_v36  ;;  %v646_v38 = vadd.f32 %v645_v37, %v644_v35 }
 0x206   :  { %v647_v39 = vpop.f32.mrf.mxu1 }
 0x207   :  { %v567_v20 = vadd.f32 %v646_v38, %v596_v13 }
 0x208   :  { %v648_v40 = vpop.f32.mrf.mxu1 }
 0x209   :  { %575 = vst [vmem:[#allocation9 + $0x28] sm:$0xff] %v567_v20  ;;  %v649_v42 = vadd.f32 %v648_v40, %v647_v39 }
 0x20a   :  { %v650_v43 = vpop.f32.mrf.mxu1 }
 0x20b   :  { %v568_v41 = vadd.f32 %v649_v42, %v596_v13 }
 0x20c   :  { %v651_v45 = vpop.f32.mrf.mxu1 }
 0x20d   :  { %576 = vst [vmem:[#allocation9 + $0x30] sm:$0xff] %v568_v41  ;;  %v652_v46 = vadd.f32 %v651_v45, %v650_v43 }
 0x20f   :  { %v569_v48 = vadd.f32 %v652_v46, %v596_v13 }
 0x211   :  { %577 = vst [vmem:[#allocation9 + $0x38] sm:$0xff] %v569_v48 }
 0x212   :  { %765 = shalt.err (!%p762_p5)
}
 0x213   :  { %589 = dma.vmem_to_hbm [thread:$0]  %s584_s12, 1024, %s991_s5, [#allocation5], %s784_s28, %s784_s28, %s785_s29  }
 0x214   :  { %778 = dma.done.wait [#allocation5], 1024  }
 0x215   :  { %779 = vsyncadd [#allocation5], 4294966272 }
 0x216   :  { %593 = vsyncpa [#allocation4], 1 }
 0x217   :  { %594 = vsyncpa [#allocation7], 1 }
 0x218   :  { %595 = vsyncpa [#allocation5], 1 }

</bundles_post_ra>
